<compile_context>
chip_gen: v7x
topology: tpu7x:2x2x1
jax: 0.10.0
libtpu: 0.0.40
codegen_flags: <defaults>
</compile_context>

<pallas_src>
import jax
import jax.numpy as jnp
from jax.experimental import pallas as pl
from jax.experimental.pallas import tpu as pltpu

LANE = 128     # lane (last-dim) granularity
SUBLANE = 8    # sublane granularity for f32


def _round_up(n, m):
    return ((n + m - 1) // m) * m


def _vmem_capacity_bytes():
    """Per-core VMEM capacity; conservative fallback if the query fails."""
    try:
        info = pltpu.get_tpu_info()
        cap = getattr(info, "vmem_capacity_bytes", None)
        if cap:
            return int(cap)
    except Exception:
        pass
    return 64 << 20   # v7x per-TensorCore VMEM (safe lower bound)


def _vmem_needed(TB, TH, Hp, Op, el, out_el, fused):
    """Estimate VMEM footprint.  Pallas double-buffers every BlockSpec (x2),
    including constant-index (resident) weight specs."""
    w_bytes = 2 * el * (Hp * TH + TH * Op + TH + Op)   # W1 chunk, W2 chunk, b1, b2
    x_bytes = 2 * el * TB * Hp                          # streamed x tile
    o_bytes = 2 * out_el * TB * Op                      # streamed out tile
    acc_bytes = 0 if fused else 4 * TB * Op             # f32 accumulator scratch
    interm = 4 * TB * TH + 4 * TB * Op                  # f32 h / out intermediates
    return w_bytes + x_bytes + o_bytes + acc_bytes + interm


# --------------------------------------------------------------------------
# Kernels
# --------------------------------------------------------------------------
def _dnn_fused_kernel(x_ref, w1_ref, b1_ref, w2_ref, b2_ref, o_ref):
    """Whole hidden dim resident: one grid step = full Linear->ReLU->Linear."""
    b1 = b1_ref[...].astype(jnp.float32)
    b2 = b2_ref[...].astype(jnp.float32)
    h = jnp.dot(x_ref[...], w1_ref[...], preferred_element_type=jnp.float32)
    h = jnp.maximum(h + b1, 0.0)
    out = jnp.dot(h.astype(w2_ref.dtype), w2_ref[...],
                  preferred_element_type=jnp.float32)
    o_ref[...] = (out + b2).astype(o_ref.dtype)


def _dnn_ktiled_kernel(x_ref, w1_ref, b1_ref, w2_ref, b2_ref, o_ref, acc_ref):
    """Hidden dim tiled (grid axis 1): partial hidden columns -> ReLU -> partial
    contribution to the output, accumulated in an f32 VMEM scratch."""
    j = pl.program_id(1)

    @pl.when(j == 0)
    def _():
        acc_ref[...] = jnp.broadcast_to(
            b2_ref[...].astype(jnp.float32), acc_ref.shape)

    h = jnp.dot(x_ref[...], w1_ref[...], preferred_element_type=jnp.float32)
    h = jnp.maximum(h + b1_ref[...].astype(jnp.float32), 0.0)
    acc_ref[...] += jnp.dot(h.astype(w2_ref.dtype), w2_ref[...],
                            preferred_element_type=jnp.float32)

    @pl.when(j == pl.num_programs(1) - 1)
    def _():
        o_ref[...] = acc_ref[...].astype(o_ref.dtype)


# --------------------------------------------------------------------------
# Wrapper
# --------------------------------------------------------------------------
def prepare_dnn_params(w1, b1, w2, b2, *, compute_dtype=jnp.bfloat16):
    """Pad / cast the weights ONCE (lane-dense, zero-padded).  Zero padding is
    semantics-preserving: padded hidden lanes get zero weight + zero bias
    (ReLU(0)=0) and padded W2 rows/cols are zero, so they never contribute.

    w1: (H, H) input-major (PyTorch weight.T), b1: (H,), w2: (H, O), b2: (O,).
    """
    H = w1.shape[0]
    O = w2.shape[1]
    Hp = _round_up(H, LANE)
    Op = _round_up(O, LANE)
    cd = compute_dtype
    w1p = jnp.zeros((Hp, Hp), cd).at[:H, :H].set(w1.astype(cd))
    b1p = jnp.zeros((1, Hp), cd).at[:, :H].set(b1.reshape(1, -1).astype(cd))
    w2p = jnp.zeros((Hp, Op), cd).at[:H, :O].set(w2.astype(cd))
    b2p = jnp.zeros((1, Op), cd).at[:, :O].set(b2.reshape(1, -1).astype(cd))
    return {"w1": w1p, "b1": b1p, "w2": w2p, "b2": b2p,
            "H": H, "O": O, "Hp": Hp, "Op": Op, "compute_dtype": cd}


def dnn_forward(x, params, *, batch_tile=None, hidden_tile=None, out_dtype=None):
    """Fused Linear -> ReLU -> Linear on pre-padded params.  x: (B, H)."""
    H, O = params["H"], params["O"]
    Hp, Op = params["Hp"], params["Op"]
    cd = params["compute_dtype"]
    w1p, b1p, w2p, b2p = params["w1"], params["b1"], params["w2"], params["b2"]
    assert x.shape[1] == H, (x.shape, H)

    B = x.shape[0]
    out_dtype = out_dtype or x.dtype
    el = jnp.dtype(cd).itemsize
    out_el = jnp.dtype(out_dtype).itemsize

    vmem_cap = _vmem_capacity_bytes()
    budget = int(0.70 * vmem_cap)
    two_core = vmem_cap <= (72 << 20)        # v7x-like: small per-core VMEM, 2 TCs
    pack = max(SUBLANE, 32 // el)            # sublane packing: 8 (f32) / 16 (bf16)

    # ---- batch tile ------------------------------------------------------
    if batch_tile is not None:
        TB = batch_tile
    elif B < 128:
        # M < 128 underfills the MXU, but for tiny serving batches the kernel is
        # weight-DMA bound anyway; just honour the dtype sublane packing.
        TB = _round_up(B, pack)
    else:
        TB = 512 if B >= 512 else (256 if B >= 256 else 128)
        # v7x: make sure the "parallel" batch axis has >=2 steps to feed both TCs.
        while two_core and TB > 128 and (B + TB - 1) // TB < 2:
            TB //= 2

    # ---- hidden tile (K-tiled fallback when weights don't fit VMEM) -------
    if hidden_tile is not None:
        TH = hidden_tile
        assert TH % LANE == 0 and Hp % TH == 0, (TH, Hp)
    else:
        TH = Hp
        while _vmem_needed(TB, TH, Hp, Op, el, out_el, TH == Hp) > budget and TH > LANE:
            nxt = TH - LANE
            while nxt >= LANE and Hp % nxt != 0:
                nxt -= LANE
            if nxt < LANE:
                break
            TH = nxt
        while _vmem_needed(TB, TH, Hp, Op, el, out_el, TH == Hp) > budget and TB > pack:
            TB = max(pack, _round_up(TB // 2, pack))

    fused = (TH == Hp)
    Bp = _round_up(B, TB)

    # ---- pad x only if actually needed -------------------------------------
    if (H != Hp) or (Bp != B) or (x.dtype != cd):
        xp = jnp.zeros((Bp, Hp), cd).at[:B, :H].set(x.astype(cd))
    else:
        xp = x

    needed = _vmem_needed(TB, TH, Hp, Op, el, out_el, fused)
    vmem_limit = int(min(max(needed + (8 << 20), 32 << 20), int(vmem_cap * 0.85)))

    cost = pl.CostEstimate(
        flops=2 * Bp * Hp * Hp + 2 * Bp * Hp * Op,
        transcendentals=0,
        bytes_accessed=el * (Bp * Hp + Hp * Hp + Hp + Hp * Op + Op)
        + out_el * Bp * Op,
    )

    if fused:
        out_padded = pl.pallas_call(
            _dnn_fused_kernel,
            out_shape=jax.ShapeDtypeStruct((Bp, Op), out_dtype),
            grid=(Bp // TB,),
            in_specs=[
                pl.BlockSpec((TB, Hp), lambda i: (i, 0)),   # x : streamed
                pl.BlockSpec((Hp, Hp), lambda i: (0, 0)),   # W1: resident
                pl.BlockSpec((1, Hp), lambda i: (0, 0)),    # b1: resident
                pl.BlockSpec((Hp, Op), lambda i: (0, 0)),   # W2: resident
                pl.BlockSpec((1, Op), lambda i: (0, 0)),    # b2: resident
            ],
            out_specs=pl.BlockSpec((TB, Op), lambda i: (i, 0)),
            compiler_params=pltpu.CompilerParams(
                dimension_semantics=("parallel",),
                vmem_limit_bytes=vmem_limit,
            ),
            cost_estimate=cost,
        )(xp, w1p, b1p, w2p, b2p)
    else:
        out_padded = pl.pallas_call(
            _dnn_ktiled_kernel,
            out_shape=jax.ShapeDtypeStruct((Bp, Op), out_dtype),
            grid=(Bp // TB, Hp // TH),
            in_specs=[
                pl.BlockSpec((TB, Hp), lambda i, j: (i, 0)),  # x (reused over j)
                pl.BlockSpec((Hp, TH), lambda i, j: (0, j)),  # W1 column chunk
                pl.BlockSpec((1, TH), lambda i, j: (0, j)),   # b1 chunk
                pl.BlockSpec((TH, Op), lambda i, j: (j, 0)),  # W2 row chunk
                pl.BlockSpec((1, Op), lambda i, j: (0, 0)),   # b2
            ],
            out_specs=pl.BlockSpec((TB, Op), lambda i, j: (i, 0)),
            scratch_shapes=[pltpu.VMEM((TB, Op), jnp.float32)],
            compiler_params=pltpu.CompilerParams(
                dimension_semantics=("parallel", "arbitrary"),
                vmem_limit_bytes=vmem_limit,
            ),
            cost_estimate=cost,
        )(xp, w1p, b1p, w2p, b2p)

    if Bp == B and Op == O:
        return out_padded
    return out_padded[:B, :O]


def init_params(key, hidden_units, out_units, dtype=jnp.float32):
    # Mimics nn.Linear default init: U(-1/sqrt(fan_in), +1/sqrt(fan_in)).
    k1, k2, k3, k4 = jax.random.split(key, 4)
    bound = 1.0 / (hidden_units ** 0.5)
    w1 = jax.random.uniform(k1, (hidden_units, hidden_units), dtype, -bound, bound)
    b1 = jax.random.uniform(k2, (hidden_units,), dtype, -bound, bound)
    w2 = jax.random.uniform(k3, (hidden_units, out_units), dtype, -bound, bound)
    b2 = jax.random.uniform(k4, (out_units,), dtype, -bound, bound)
    return w1, b1, w2, b2


if __name__ == "__main__":
    key = jax.random.PRNGKey(0)
    k1, k2, k3, k4 = jax.random.split(key, 4)

    # ---- Case 1: tiny DNN (batch=8, hidden=32, out=16), fused path --------
    batch, hidden_units, out_units = 8, 32, 16
    x = jax.random.normal(k1, (batch, hidden_units), jnp.float32)
    w1, b1, w2, b2 = init_params(k2, hidden_units, out_units)
    ref = jnp.maximum(x @ w1 + b1[None, :], 0.0) @ w2 + b2[None, :]

    # Default bf16 matmul operands (f32 accumulation) -> dtype-aware tolerance.
    params_bf16 = prepare_dnn_params(w1, b1, w2, b2, compute_dtype=jnp.bfloat16)
    out_bf16 = jax.block_until_ready(dnn_forward(x, params_bf16))
    assert out_bf16.shape == (batch, out_units)
    assert jnp.allclose(out_bf16, ref, atol=3e-2, rtol=3e-2), \
        float(jnp.max(jnp.abs(out_bf16 - ref)))

    # Full f32 operands -> tight tolerance.
    params_f32 = prepare_dnn_params(w1, b1, w2, b2, compute_dtype=jnp.float32)
    out_f32 = jax.block_until_ready(dnn_forward(x, params_f32))
    assert jnp.allclose(out_f32, ref, atol=1e-5, rtol=1e-5)

    # ---- Case 2: exercise the hidden(K)-tiled fallback path ---------------
    batch2, hidden2, out2 = 16, 256, 64
    x2 = jax.random.normal(k3, (batch2, hidden2), jnp.float32)
    w1b, b1b, w2b, b2b = init_params(k4, hidden2, out2)
    ref2 = jnp.maximum(x2 @ w1b + b1b[None, :], 0.0) @ w2b + b2b[None, :]
    params2 = prepare_dnn_params(w1b, b1b, w2b, b2b, compute_dtype=jnp.float32)
    out2_ = jax.block_until_ready(dnn_forward(x2, params2, hidden_tile=128))
    assert out2_.shape == (batch2, out2)
    assert jnp.allclose(out2_, ref2, atol=1e-4, rtol=1e-4), \
        float(jnp.max(jnp.abs(out2_ - ref2)))

    print("KERNEL_OK")
</pallas_src>

<mosaic_0001>
module attributes {stable_mosaic.version = 11 : i64} {
  func.func @_dnn_fused_kernel(%arg0: i32, %arg1: memref<16x128xbf16, #tpu.memory_space<vmem>>, %arg2: memref<128x128xbf16, #tpu.memory_space<vmem>>, %arg3: memref<1x128xbf16, #tpu.memory_space<vmem>>, %arg4: memref<128x128xbf16, #tpu.memory_space<vmem>>, %arg5: memref<1x128xbf16, #tpu.memory_space<vmem>>, %arg6: memref<16x128xf32, #tpu.memory_space<vmem>>) attributes {dimension_semantics = [#tpu.dimension_semantics<parallel>], iteration_bounds = array<i64: 1>, scalar_prefetch = 0 : i64, scratch_operands = 0 : i64, tpu.core_type = #tpu.core_type<tc>, window_params = [{transform_indices = @transform_0, window_bounds = array<i64: 16, 128>}, {pipeline_mode = #tpu.pipeline_mode<synchronous>, transform_indices = @transform_1, window_bounds = array<i64: 128, 128>}, {pipeline_mode = #tpu.pipeline_mode<synchronous>, transform_indices = @transform_2, window_bounds = array<i64: 1, 128>}, {pipeline_mode = #tpu.pipeline_mode<synchronous>, transform_indices = @transform_3, window_bounds = array<i64: 128, 128>}, {pipeline_mode = #tpu.pipeline_mode<synchronous>, transform_indices = @transform_4, window_bounds = array<i64: 1, 128>}, {transform_indices = @transform_5, window_bounds = array<i64: 16, 128>}]} {
    %c0 = arith.constant 0 : index
    %c0_0 = arith.constant 0 : index
    %0 = vector.load %arg3[%c0, %c0_0] : memref<1x128xbf16, #tpu.memory_space<vmem>>, vector<1x128xbf16>
    %1 = arith.extf %0 : vector<1x128xbf16> to vector<1x128xf32>
    %c0_1 = arith.constant 0 : index
    %c0_2 = arith.constant 0 : index
    %2 = vector.load %arg5[%c0_1, %c0_2] : memref<1x128xbf16, #tpu.memory_space<vmem>>, vector<1x128xbf16>
    %3 = arith.extf %2 : vector<1x128xbf16> to vector<1x128xf32>
    %c0_3 = arith.constant 0 : index
    %c0_4 = arith.constant 0 : index
    %4 = vector.load %arg1[%c0_3, %c0_4] : memref<16x128xbf16, #tpu.memory_space<vmem>>, vector<16x128xbf16>
    %c0_5 = arith.constant 0 : index
    %c0_6 = arith.constant 0 : index
    %5 = vector.load %arg2[%c0_5, %c0_6] : memref<128x128xbf16, #tpu.memory_space<vmem>>, vector<128x128xbf16>
    %cst = arith.constant dense<0.000000e+00> : vector<16x128xf32>
    %6 = tpu.matmul %4, %5, %cst {dimension_numbers = #tpu.dot_dimension_numbers<[1], [0], [0], [1], [0, 0, 1, 1], [], []>} : vector<16x128xbf16>, vector<128x128xbf16>, vector<16x128xf32> -> vector<16x128xf32>
    %7 = vector.broadcast %1 : vector<1x128xf32> to vector<16x128xf32>
    %8 = arith.addf %6, %7 : vector<16x128xf32>
    %cst_7 = arith.constant 0.000000e+00 : f32
    %9 = vector.broadcast %cst_7 : f32 to vector<16x128xf32>
    %10 = arith.maximumf %8, %9 : vector<16x128xf32>
    %11 = arith.truncf %10 : vector<16x128xf32> to vector<16x128xbf16>
    %c0_8 = arith.constant 0 : index
    %c0_9 = arith.constant 0 : index
    %12 = vector.load %arg4[%c0_8, %c0_9] : memref<128x128xbf16, #tpu.memory_space<vmem>>, vector<128x128xbf16>
    %cst_10 = arith.constant dense<0.000000e+00> : vector<16x128xf32>
    %13 = tpu.matmul %11, %12, %cst_10 {dimension_numbers = #tpu.dot_dimension_numbers<[1], [0], [0], [1], [0, 0, 1, 1], [], []>} : vector<16x128xbf16>, vector<128x128xbf16>, vector<16x128xf32> -> vector<16x128xf32>
    %14 = vector.broadcast %3 : vector<1x128xf32> to vector<16x128xf32>
    %15 = arith.addf %13, %14 : vector<16x128xf32>
    %c0_11 = arith.constant 0 : index
    %c0_12 = arith.constant 0 : index
    %16 = vector.load %arg6[%c0_11, %c0_12] : memref<16x128xf32, #tpu.memory_space<vmem>>, vector<16x128xf32>
    tpu.vector_store %arg6[%c0_11, %c0_12], %15 {strides = array<i32>} : memref<16x128xf32, #tpu.memory_space<vmem>>, vector<16x128xf32>,
    return
  }
  func.func @transform_0(%arg0: i32) -> (i32, i32) {
    %c0_i32 = arith.constant 0 : i32
    %c0_i32_0 = arith.constant 0 : i32
    return %arg0, %c0_i32 : i32, i32
  }
  func.func @transform_1(%arg0: i32) -> (i32, i32) {
    %c0_i32 = arith.constant 0 : i32
    %c0_i32_0 = arith.constant 0 : i32
    %c0_i32_1 = arith.constant 0 : i32
    return %c0_i32, %c0_i32_0 : i32, i32
  }
  func.func @transform_2(%arg0: i32) -> (i32, i32) {
    %c0_i32 = arith.constant 0 : i32
    %c0_i32_0 = arith.constant 0 : i32
    %c0_i32_1 = arith.constant 0 : i32
    return %c0_i32, %c0_i32_0 : i32, i32
  }
  func.func @transform_3(%arg0: i32) -> (i32, i32) {
    %c0_i32 = arith.constant 0 : i32
    %c0_i32_0 = arith.constant 0 : i32
    %c0_i32_1 = arith.constant 0 : i32
    return %c0_i32, %c0_i32_0 : i32, i32
  }
  func.func @transform_4(%arg0: i32) -> (i32, i32) {
    %c0_i32 = arith.constant 0 : i32
    %c0_i32_0 = arith.constant 0 : i32
    %c0_i32_1 = arith.constant 0 : i32
    return %c0_i32, %c0_i32_0 : i32, i32
  }
  func.func @transform_5(%arg0: i32) -> (i32, i32) {
    %c0_i32 = arith.constant 0 : i32
    %c0_i32_0 = arith.constant 0 : i32
    return %arg0, %c0_i32 : i32, i32
  }
}

</mosaic_0001>

<bundles_post_ra>
// kernel: tpu_custom_call.1
= control target key start
LH: loop header
LB: loop body
LE: loop exit
PB: predicated region body
PF: predicated region fallthrough
CT: control target
= control target key end

     0   :  { %10 = vsyncpa [#allocation3], 0  ;;  %s622_s0 = inlined_call_operand.hbm [shape: bf16[16,128], index: 0, kind: input, shape index: {}]   ;;  %s623_s1 = inlined_call_operand.hbm [shape: bf16[128,128], index: 1, kind: input, shape index: {}]   ;;  %s624_s2 = inlined_call_operand.vmem [shape: bf16[1,128], index: 2, kind: input, shape index: {}]   ;;  %s625_s3 = inlined_call_operand.hbm [shape: bf16[128,128], index: 3, kind: input, shape index: {}]   ;;  %s626_s4 = inlined_call_operand.vmem [shape: bf16[1,128], index: 4, kind: input, shape index: {}]   ;;  %s627_s5 = inlined_call_operand.hbm [shape: f32[16,128], index: 5, kind: output, shape index: {}]  }
   0x1   :  { %11 = vsyncpa [#allocation6], 0 }
   0x2   :  { %12 = vsyncpa [#allocation4], 0  ;;  %s512_s18 = smov [#allocation5]   ;;  %s513_s20 = smov [#allocation2]  }
   0x3   :  { %s30_s19 = sshll.u32 %s512_s18, 4  ;;  %s18_s21 = sshll.u32 %s513_s20, 4  ;;  %s31_s19 = int_to_ptr.vmem [resolvable:$true] %s30_s19  ;;  %s552_s21 = int_to_ptr.vmem [resolvable:$true] %s18_s21 }
   0x4   :  { %s418_s24 = scalar_lea.hbm %s623_s1, 1024 }
   0x5   :  { %p419_p0 = scmp.ne.s32.totalorder %s623_s1, %s418_s24  ;;  %p422_p1 = scmp.lt.u32.totalorder %s418_s24, %s623_s1 }
   0x7   :  { %p424_p2 = pnand %p422_p1, %p419_p0 }
   0x9   :  { %427 = shalt.err (!%p424_p2)
}
   0xa   :  { %s428_s29 = scalar_lea.vmem %s31_s19, 1024  ;;  %p433_p4 = scmp.lt.s32.totalorder %s31_s19, %s31_s19 }
   0xb   :  { %p429_p3 = scmp.ne.s32.totalorder %s31_s19, %s428_s29  ;;  %p434_p5 = scmp.lt.s32.totalorder %s428_s29, %s428_s29 }
   0xd   :  { %p435_p6 = por %p434_p5, %p433_p4 }
   0xf   :  { %p436_p7 = pnand %p435_p6, %p429_p3 }
  0x11   :  { %439 = shalt.err (!%p436_p7)
}
  0x12   :  { %s514_s30 = smov 64   ;;  %s515_s6 = smov 4  }
  0x13   :  { %36 = dma.hbm_to_vmem [thread:$0]  %s623_s1, 1024, %s31_s19, [#allocation6], %s514_s30, %s514_s30, %s515_s6  }
  0x14   :  { %s440_s11 = scalar_lea.hbm %s622_s0, 128 }
  0x15   :  { %p441_p8 = scmp.ne.s32.totalorder %s622_s0, %s440_s11  ;;  %p444_p9 = scmp.lt.u32.totalorder %s440_s11, %s622_s0 }
  0x17   :  { %p446_p10 = pnand %p444_p9, %p441_p8 }
  0x19   :  { %449 = shalt.err (!%p446_p10)
}
  0x1a   :  { %s450_s16 = scalar_lea.vmem %s552_s21, 128  ;;  %p455_p12 = scmp.lt.s32.totalorder %s552_s21, %s552_s21 }
  0x1b   :  { %p451_p11 = scmp.ne.s32.totalorder %s552_s21, %s450_s16  ;;  %p456_p13 = scmp.lt.s32.totalorder %s450_s16, %s450_s16 }
  0x1d   :  { %p457_p0 = por %p456_p13, %p455_p12 }
  0x1f   :  { %p458_p1 = pnand %p457_p0, %p451_p11 }
  0x21   :  { %461 = shalt.err (!%p458_p1)
}
  0x22   :  { %24 = dma.hbm_to_vmem [thread:$0]  %s622_s0, 128, %s552_s21, [#allocation3], %s514_s30, %s514_s30, %s515_s6  }
  0x23   :  { %s516_s18 = smov [#allocation7]   ;;  %s462_s23 = scalar_lea.hbm %s625_s3, 1024 }
  0x24   :  { %s44_s19 = sshll.u32 %s516_s18, 4  ;;  %p463_p2 = scmp.ne.s32.totalorder %s625_s3, %s462_s23  ;;  %s45_s19 = int_to_ptr.vmem [resolvable:$true] %s44_s19 }
  0x25   :  { %p466_p3 = scmp.lt.u32.totalorder %s462_s23, %s625_s3 }
  0x27   :  { %p468_p4 = pnand %p466_p3, %p463_p2 }
  0x29   :  { %471 = shalt.err (!%p468_p4)
}
  0x2a   :  { %s472_s28 = scalar_lea.vmem %s45_s19, 1024  ;;  %p477_p6 = scmp.lt.s32.totalorder %s45_s19, %s45_s19 }
  0x2b   :  { %p473_p5 = scmp.ne.s32.totalorder %s45_s19, %s472_s28  ;;  %p478_p7 = scmp.lt.s32.totalorder %s472_s28, %s472_s28 }
  0x2d   :  { %p479_p8 = por %p478_p7, %p477_p6 }
  0x2f   :  { %p480_p9 = pnand %p479_p8, %p473_p5 }
  0x31   :  { %483 = shalt.err (!%p480_p9)
}
  0x32   :  { %50 = dma.hbm_to_vmem [thread:$0]  %s625_s3, 1024, %s45_s19, [#allocation6], %s514_s30, %s514_s30, %s515_s6  }
  0x33   :  { %506 = dma.done.wait [#allocation3], 128  }
  0x34   :  { %507 = vsyncadd [#allocation3], 4294967168 }
  0x35   :  { %508 = dma.done.wait [#allocation6], 2048  }
  0x36   :  { %509 = vsyncadd [#allocation6], 4294965248  ;;  %v517_v0 = vmov 0.0   ;;  %vm518_vm0 = vmmov 0   ;;  %v401_v1 = vld [vmem:[#allocation5] sm:$0xff]   ;;  %v402_v2 = vld [vmem:[#allocation5 + $0x8] sm:$0xff]   ;;  %v85_v18 = vlaneseq }
  0x37   :  { %351 = vmatprep.subr.bf16.mxu0 %v517_v0  ;;  %367 = vmatprep.mubr.msk.bf16.mxu0 %vm518_vm0, %v517_v0  ;;  %v403_v3 = vld [vmem:[#allocation5 + $0x10] sm:$0xff]   ;;  %v410_v4 = vld [vmem:[#allocation7] sm:$0xff]   ;;  %v404_v5 = vld [vmem:[#allocation5 + $0x18] sm:$0xff]  }
  0x38   :  { %371 = vmatprep.subr.bf16.mxu1 %v517_v0  ;;  %387 = vmatprep.mubr.msk.bf16.mxu1 %vm518_vm0, %v517_v0  ;;  %v411_v6 = vld [vmem:[#allocation7 + $0x8] sm:$0xff]   ;;  %v405_v7 = vld [vmem:[#allocation5 + $0x20] sm:$0xff]   ;;  %v412_v8 = vld [vmem:[#allocation7 + $0x10] sm:$0xff]   ;;  %v86_v19 = vshrl.u32 %v85_v18, 7 }
  0x39   :  { %352 = vmatpush3.bf16.msra.mxu0 %v401_v1  ;;  %372 = vmatpush3.bf16.msra.mxu1 %v410_v4  ;;  %v406_v9 = vld [vmem:[#allocation5 + $0x28] sm:$0xff]   ;;  %v413_v10 = vld [vmem:[#allocation7 + $0x18] sm:$0xff]   ;;  %v407_v11 = vld [vmem:[#allocation5 + $0x30] sm:$0xff]  }
  0x3a   :  { %353 = vmatprep.subr.bf16.mxu0 %v517_v0  ;;  %373 = vmatprep.subr.bf16.mxu1 %v517_v0  ;;  %v414_v12 = vld [vmem:[#allocation7 + $0x20] sm:$0xff]   ;;  %v408_v13 = vld [vmem:[#allocation5 + $0x38] sm:$0xff]   ;;  %v415_v14 = vld [vmem:[#allocation7 + $0x28] sm:$0xff]   ;;  %v87_v22 = vsub.s32 0, %v86_v19 }
  0x3b   :  { %v409_v15 = vld [vmem:[#allocation2] sm:$0xff]   ;;  %v416_v16 = vld [vmem:[#allocation7 + $0x30] sm:$0xff]  }
  0x3c   :  { %v417_v17 = vld [vmem:[#allocation7 + $0x38] sm:$0xff]  }
  0x3d   :  { %354 = vmatpush3.bf16.msra.mxu0 %v402_v2  ;;  %374 = vmatpush3.bf16.msra.mxu1 %v411_v6  ;;  %v63_v20 = vld [vmem:[%s624_s2] sm:$0x1]  ;;  %s519_s2 = smov [#allocation8]  }
  0x3e   :  { %355 = vmatprep.subr.bf16.mxu0 %v517_v0  ;;  %375 = vmatprep.subr.bf16.mxu1 %v517_v0  ;;  %v64_v21 = vunpack.c.l.bf16 %v63_v20  ;;  %v65_v33 = vld [vmem:[%s626_s4] sm:$0x1]  ;;  %s303_s7 = sshll.u32 %s519_s2, 4  ;;  %s304_s7 = int_to_ptr.vmem [resolvable:$true] %s303_s7 }
  0x3f   :  { %v66_v34 = vunpack.c.l.bf16 %v65_v33  ;;  %s484_s8 = scalar_lea.vmem %s304_s7, 256  ;;  %p489_p11 = scmp.lt.s32.totalorder %s304_s7, %s304_s7 }
  0x40   :  { %v88_v23 = vrot.slane %v64_v21, %v87_v22  ;;  %p485_p10 = scmp.ne.s32.totalorder %s304_s7, %s484_s8  ;;  %p490_p12 = scmp.lt.s32.totalorder %s484_s8, %s484_s8 }
  0x41   :  { %356 = vmatpush3.bf16.msra.mxu0 %v403_v3  ;;  %376 = vmatpush3.bf16.msra.mxu1 %v412_v8  ;;  %v206_v35 = vrot.slane %v66_v34, %v87_v22 }
  0x42   :  { %357 = vmatprep.subr.bf16.mxu0 %v517_v0  ;;  %377 = vmatprep.subr.bf16.mxu1 %v517_v0  ;;  %p491_p13 = por %p490_p12, %p489_p11 }
  0x44   :  { %p492_p0 = pnand %p491_p13, %p485_p10 }
  0x45   :  { %358 = vmatpush3.bf16.msra.mxu0 %v404_v5  ;;  %378 = vmatpush3.bf16.msra.mxu1 %v413_v10 }
  0x46   :  { %359 = vmatprep.subr.bf16.mxu0 %v517_v0  ;;  %379 = vmatprep.subr.bf16.mxu1 %v517_v0 }
  0x49   :  { %360 = vmatpush3.bf16.msra.mxu0 %v405_v7  ;;  %380 = vmatpush3.bf16.msra.mxu1 %v414_v12 }
  0x4a   :  { %361 = vmatprep.subr.bf16.mxu0 %v517_v0  ;;  %381 = vmatprep.subr.bf16.mxu1 %v517_v0 }
  0x4d   :  { %362 = vmatpush3.bf16.msra.mxu0 %v406_v9  ;;  %382 = vmatpush3.bf16.msra.mxu1 %v415_v14 }
  0x4e   :  { %363 = vmatprep.subr.bf16.mxu0 %v517_v0  ;;  %383 = vmatprep.subr.bf16.mxu1 %v517_v0 }
  0x51   :  { %364 = vmatpush3.bf16.msra.mxu0 %v407_v11  ;;  %384 = vmatpush3.bf16.msra.mxu1 %v416_v16 }
  0x52   :  { %365 = vmatprep.subr.bf16.mxu0 %v517_v0  ;;  %385 = vmatprep.subr.bf16.mxu1 %v517_v0 }
  0x55   :  { %366 = vmatpush3.bf16.msra.mxu0 %v408_v13  ;;  %386 = vmatpush3.bf16.msra.mxu1 %v417_v17 }
  0x58   :  { %368 = vmatmul.mubr.bf16.vlgmr.msra.gmra.mrb[0].mxu0 %v409_v15 }
 0x12b   :  { %v177_v24 = vpop.f32.mrb[0].mxu0 }
 0x12c   :  { %v178_v25 = vadd.f32 %v177_v24, %v88_v23  ;;  %v369_v26 = vpop.f32.mrb[1].mxu0 }
 0x12d   :  { %v180_v27 = vpop.f32.mrb[2].mxu0 }
 0x12e   :  { %v181_v28 = vadd.f32 %v180_v27, %v88_v23  ;;  %v370_v29 = vpop.f32.mrb[3].mxu0  ;;  %v184_v30 = vmax.f32 %v178_v25, 0.0 }
 0x130   :  { %v185_v31 = vmax.f32 %v181_v28, 0.0 }
 0x132   :  { %v186_v32 = vpack.c.bf16 %v185_v31, %v184_v30 }
 0x134   :  { %388 = vmatmul.mubr.bf16.vlgmr.msra.gmra.mrb[0].mxu1 %v186_v32 }
 0x207   :  { %v289_v36 = vpop.f32.mrb[0].mxu1 }
 0x208   :  { %v290_v37 = vadd.f32 %v289_v36, %v206_v35  ;;  %v389_v38 = vpop.f32.mrb[1].mxu1 }
 0x209   :  { %v292_v39 = vpop.f32.mrb[2].mxu1 }
 0x20a   :  { %296 = vst [vmem:[#allocation8] sm:$0xff] %v290_v37  ;;  %v293_v40 = vadd.f32 %v292_v39, %v206_v35  ;;  %v390_v41 = vpop.f32.mrb[3].mxu1 }
 0x20c   :  { %297 = vst [vmem:[#allocation8 + $0x8] sm:$0xff] %v293_v40 }
 0x20d   :  { %495 = shalt.err (!%p492_p0)
}
 0x20e   :  { %s496_s10 = scalar_lea.hbm %s627_s5, 256 }
 0x20f   :  { %p497_p1 = scmp.ne.s32.totalorder %s627_s5, %s496_s10  ;;  %p500_p2 = scmp.lt.u32.totalorder %s496_s10, %s627_s5 }
 0x211   :  { %p502_p3 = pnand %p500_p2, %p497_p1 }
 0x213   :  { %505 = shalt.err (!%p502_p3)
}
 0x214   :  { %s520_s15 = smov 128   ;;  %s521_s16 = smov 8  }
 0x215   :  { %309 = dma.vmem_to_hbm [thread:$0]  %s304_s7, 256, %s627_s5, [#allocation4], %s520_s15, %s520_s15, %s521_s16  }
 0x216   :  { %510 = dma.done.wait [#allocation4], 256  }
 0x217   :  { %511 = vsyncadd [#allocation4], 4294967040 }
 0x218   :  { %313 = vsyncpa [#allocation3], 1 }
 0x219   :  { %314 = vsyncpa [#allocation6], 1 }
 0x21a   :  { %315 = vsyncpa [#allocation4], 1 }

</bundles_post_ra>
